<compile_context>
chip_gen: v7x
topology: tpu7x:2x2x1
jax: 0.10.0
libtpu: 0.0.40
codegen_flags: <defaults>
</compile_context>

<pallas_src>
import functools
import math

import jax
import jax.numpy as jnp
import numpy as np
from jax.experimental import pallas as pl
from jax.experimental.pallas import tpu as pltpu

# Lane-pack cap: fills the 256-wide MXU on v6e/v7x while bounding the O(L^2) growth of
# the block-diagonal pool operand (per review, do not widen L beyond ~256).
_L_CAP = 256


def _spatial_convs_kernel(x_ref, m_ref, ab_ref, bias_ref, o_ref, *, feat):
    """One grid step = Bt batch elements packed along the lane axis.

    x_ref    : (1, Wc, L) f32, L = Bt * feat, lane l = b * feat + f
    m_ref    : (Wc, 8*Wc) f32  -- [M_{-3} .. M_{+3}, Wp_pool] folded channel weights
    ab_ref   : (2L, L)    bf16 -- stacked blockdiag(even-select @ fc_w.T) for max|avg
    bias_ref : (Wc, L)    f32  -- (sum_w Wp_pool[o,w]) * fc_b, tiled over batch lanes
    """
    f32 = jnp.float32
    xp = x_ref[0]                                     # (Wc, L) f32
    Wc, L = xp.shape

    # feature position inside each length-`feat` batch segment, per lane
    lane_f = jax.lax.broadcasted_iota(jnp.int32, (Wc, L), 1) % feat

    def lane_roll(v, k):
        # out[:, l] = v[:, (l + k) % L]  -- static lane rotation via slice + concat
        k = k % L
        if k == 0:
            return v
        return jnp.roll(v, -k, axis=1)

    def seg_roll(v, s):
        # out[w, b*feat + f] = v[w, b*feat + (f + s) % feat]  (circular inside segment)
        if s % feat == 0:
            return v
        base = lane_roll(v, s)
        if s > 0:
            alt = lane_roll(v, s - feat)
            return jnp.where(lane_f >= feat - s, alt, base)
        alt = lane_roll(v, s + feat)
        return jnp.where(lane_f < -s, alt, base)

    # 7 circularly shifted copies of x: taps s = -3 .. +3
    shifted = [seg_roll(xp, s) for s in range(-3, 4)]

    # MaxPool1d(2) / AvgPool1d(2) + fc: even-column selection and fc.T are pre-folded
    # into ONE (2L, L) block-diagonal operand -> a single MXU fill/drain.
    x_next = shifted[4]                               # shift s = +1
    pair_max = jnp.maximum(xp, x_next)
    pair_avg = 0.5 * (xp + x_next)
    pool_in = jnp.concatenate([pair_max, pair_avg], axis=1).astype(ab_ref.dtype)  # (Wc, 2L)
    pool_f = jnp.dot(pool_in, ab_ref[...], preferred_element_type=f32)            # (Wc, L)

    # One fused matmul for identity + conv1x + conv3x + conv7x + conv_proj (+ pool proj)
    x_big = jnp.concatenate(shifted + [pool_f], axis=0)          # (8*Wc, L) f32
    out = jnp.dot(m_ref[...], x_big, preferred_element_type=f32) + bias_ref[...]
    o_ref[0] = out.astype(o_ref.dtype)                # lane-dense (Wc, L) store


@jax.jit
def spatial_convs_pallas(x, w1, w3, w7, wp, fc_w, fc_b):
    """x: (B, win_size, num_features). Conv weights in PyTorch layout (out, in, k)."""
    B, Wc, F = x.shape
    assert F % 2 == 0, "num_features must be even (MaxPool1d/AvgPool1d kernel 2)"
    assert F > 6, "segment-circular shift decomposition assumes num_features > 6"
    f32 = jnp.float32
    bf16 = jnp.bfloat16
    hi = jax.lax.Precision.HIGHEST

    # Pack as many batch elements per grid step as the lane cap allows (fewest steps).
    Bt = max(1, min(B, _L_CAP // F))
    G = -(-B // Bt)
    pad_b = G * Bt - B
    L = Bt * F

    # ---------- host-side weight folding (exact, f32, done once outside kernel) ----------
    wp_g = [wp[:, g * Wc:(g + 1) * Wc, 0].astype(f32) for g in range(5)]
    taps = []
    for s in range(-3, 4):
        m = jnp.zeros((Wc, Wc), f32)
        if s == 0:
            m = m + wp_g[0] + jnp.dot(wp_g[1], w1[:, :, 0].astype(f32), precision=hi)
        if abs(s) <= 1:
            m = m + jnp.dot(wp_g[2], w3[:, :, s + 1].astype(f32), precision=hi)
        m = m + jnp.dot(wp_g[3], w7[:, :, s + 3].astype(f32), precision=hi)
        taps.append(m)
    taps.append(wp_g[4])                                              # pool-channel proj
    m_big = jnp.concatenate(taps, axis=1)                             # (Wc, 8*Wc) f32

    H = F // 2
    a_sel = jnp.zeros((F, F), f32).at[0::2, :].set(fc_w[:, :H].astype(f32).T)   # max path
    b_sel = jnp.zeros((F, F), f32).at[0::2, :].set(fc_w[:, H:].astype(f32).T)   # avg path
    eye_bt = jnp.eye(Bt, dtype=f32)
    ab_bd = jnp.concatenate([jnp.kron(eye_bt, a_sel),
                             jnp.kron(eye_bt, b_sel)], axis=0).astype(bf16)     # (2L, L)
    bias_out = jnp.outer(wp_g[4].sum(axis=1), jnp.tile(fc_b.astype(f32), Bt))   # (Wc, L)

    # ---------- layout plumbing: pack batch along lanes -> (G, Wc, Bt*F) ----------
    xq = x.astype(f32)
    if pad_b:
        xq = jnp.pad(xq, ((0, pad_b), (0, 0), (0, 0)))
    x_packed = xq.reshape(G, Bt, Wc, F).transpose(0, 2, 1, 3).reshape(G, Wc, L)

    out_packed = pl.pallas_call(
        functools.partial(_spatial_convs_kernel, feat=F),
        out_shape=jax.ShapeDtypeStruct((G, Wc, L), x.dtype),
        grid=(G,),
        in_specs=[
            pl.BlockSpec((1, Wc, L), lambda g: (g, 0, 0)),
            pl.BlockSpec((Wc, 8 * Wc), lambda g: (0, 0)),      # constant index_map
            pl.BlockSpec((2 * L, L), lambda g: (0, 0)),        # constant index_map
            pl.BlockSpec((Wc, L), lambda g: (0, 0)),           # constant index_map
        ],
        out_specs=pl.BlockSpec((1, Wc, L), lambda g: (g, 0, 0)),
        compiler_params=pltpu.CompilerParams(dimension_semantics=("parallel",)),
    )(x_packed, m_big, ab_bd, bias_out)

    out = out_packed.reshape(G, Wc, Bt, F).transpose(0, 2, 1, 3).reshape(G * Bt, Wc, F)
    return out[:B]


def spatial_convs_reference(x, w1, w3, w7, wp, fc_w, fc_b):
    """Pure-JAX reference matching the PyTorch forward exactly."""
    def conv1d(inp, w, circ_pad):
        if circ_pad:
            inp = jnp.concatenate([inp[..., -circ_pad:], inp, inp[..., :circ_pad]], axis=-1)
        return jax.lax.conv_general_dilated(
            inp, w, window_strides=(1,), padding='VALID',
            dimension_numbers=('NCH', 'OIH', 'NCH'),
            precision=jax.lax.Precision.HIGHEST)

    B, Wc, F = x.shape
    identity = x
    c1 = conv1d(x, w1, 0)
    c3 = conv1d(x, w3, 1)
    c7 = conv1d(x, w7, 3)
    xp = x.reshape(B, Wc, F // 2, 2)
    max_f = xp.max(axis=-1)
    avg_f = xp.mean(axis=-1)
    pool = jnp.concatenate([max_f, avg_f], axis=-1)
    pool = jnp.einsum('bwf,gf->bwg', pool, fc_w,
                      precision=jax.lax.Precision.HIGHEST) + fc_b
    feats = jnp.concatenate([identity, c1, c3, c7, pool], axis=-2)
    return conv1d(feats, wp, 0)


if __name__ == "__main__":
    B, WIN, FEAT = 8, 8, 32        # batch, win_size (channels), num_features (length)
    key = jax.random.PRNGKey(0)
    kx, k1, k3, k7, kp, kfw, kfb = jax.random.split(key, 7)

    def kaiming_normal(k, shape):  # fan_in mode, leaky_relu (slope 0.01) gain
        fan_in = shape[1] * shape[2]
        gain = math.sqrt(2.0 / (1.0 + 0.01 ** 2))
        return (gain / math.sqrt(fan_in)) * jax.random.normal(k, shape, jnp.float32)

    x = jax.random.normal(kx, (B, WIN, FEAT), jnp.float32)
    w1 = kaiming_normal(k1, (WIN, WIN, 1))
    w3 = kaiming_normal(k3, (WIN, WIN, 3))
    w7 = kaiming_normal(k7, (WIN, WIN, 7))
    wp = kaiming_normal(kp, (WIN, 5 * WIN, 1))
    bound = 1.0 / math.sqrt(FEAT)                       # nn.Linear default init
    fc_w = jax.random.uniform(kfw, (FEAT, FEAT), jnp.float32, -bound, bound)
    fc_b = jax.random.uniform(kfb, (FEAT,), jnp.float32, -bound, bound)

    out = spatial_convs_pallas(x, w1, w3, w7, wp, fc_w, fc_b)
    out = jax.block_until_ready(out)

    ref = spatial_convs_reference(x, w1, w3, w7, wp, fc_w, fc_b)
    assert out.shape == (B, WIN, FEAT)
    # Tolerance absorbs bf16 pool-path operands and worst-case MXU rounding of the f32
    # matmul; semantic bugs would be O(1) (output std ~1.7), far above this threshold.
    np.testing.assert_allclose(np.asarray(out), np.asarray(ref), rtol=3e-2, atol=3e-2)
    print("KERNEL_OK")
</pallas_src>

<mosaic_0001>
module attributes {stable_mosaic.version = 11 : i64} {
  func.func @_spatial_convs_kernel(%arg0: i32, %arg1: memref<1x8x256xf32, #tpu.memory_space<vmem>>, %arg2: memref<8x64xf32, #tpu.memory_space<vmem>>, %arg3: memref<512x256xbf16, #tpu.memory_space<vmem>>, %arg4: memref<8x256xf32, #tpu.memory_space<vmem>>, %arg5: memref<1x8x256xf32, #tpu.memory_space<vmem>>) attributes {dimension_semantics = [#tpu.dimension_semantics<parallel>], iteration_bounds = array<i64: 1>, scalar_prefetch = 0 : i64, scratch_operands = 0 : i64, tpu.core_type = #tpu.core_type<tc>, window_params = [{transform_indices = @transform_0, window_bounds = array<i64: 1, 8, 256>}, {pipeline_mode = #tpu.pipeline_mode<synchronous>, transform_indices = @transform_1, window_bounds = array<i64: 8, 64>}, {pipeline_mode = #tpu.pipeline_mode<synchronous>, transform_indices = @transform_2, window_bounds = array<i64: 512, 256>}, {pipeline_mode = #tpu.pipeline_mode<synchronous>, transform_indices = @transform_3, window_bounds = array<i64: 8, 256>}, {transform_indices = @transform_4, window_bounds = array<i64: 1, 8, 256>}]} {
    %c0 = arith.constant 0 : index
    %c0_0 = arith.constant 0 : index
    %c0_1 = arith.constant 0 : index
    %0 = vector.load %arg1[%c0, %c0_0, %c0_1] : memref<1x8x256xf32, #tpu.memory_space<vmem>>, vector<1x8x256xf32>
    %1 = vector.shape_cast %0 : vector<1x8x256xf32> to vector<8x256xf32>
    %2 = tpu.iota {dimensions = array<i32: 1>} : vector<8x256xi32>
    %c32_i32 = arith.constant 32 : i32
    %c0_i32 = arith.constant 0 : i32
    %3 = arith.cmpi eq, %c32_i32, %c0_i32 : i32
    %c1_i32 = arith.constant 1 : i32
    %4 = arith.select %3, %c1_i32, %c32_i32 : i32
    %5 = vector.broadcast %4 : i32 to vector<8x256xi32>
    %6 = arith.remsi %2, %5 : vector<8x256xi32>
    %c0_i32_2 = arith.constant 0 : i32
    %7 = vector.broadcast %c0_i32_2 : i32 to vector<8x256xi32>
    %8 = arith.cmpi ne, %6, %7 : vector<8x256xi32>
    %c0_i32_3 = arith.constant 0 : i32
    %9 = vector.broadcast %c0_i32_3 : i32 to vector<8x256xi32>
    %10 = arith.cmpi slt, %6, %9 : vector<8x256xi32>
    %c0_i32_4 = arith.constant 0 : i32
    %11 = arith.cmpi slt, %4, %c0_i32_4 : i32
    %12 = vector.broadcast %11 : i1 to vector<8x256xi1>
    %13 = vector.broadcast %12 : vector<8x256xi1> to vector<8x256xi1>
    %14 = arith.xori %10, %13 : vector<8x256xi1>
    %15 = arith.andi %14, %8 : vector<8x256xi1>
    %16 = vector.broadcast %4 : i32 to vector<8x256xi32>
    %17 = arith.addi %6, %16 : vector<8x256xi32>
    %18 = arith.select %15, %17, %6 : vector<8x256xi1>, vector<8x256xi32>
    %19 = vector.extract_strided_slice %1 {offsets = [0, 253], sizes = [8, 3], strides = [1, 1]} : vector<8x256xf32> to vector<8x3xf32>
    %20 = vector.extract_strided_slice %1 {offsets = [0, 0], sizes = [8, 253], strides = [1, 1]} : vector<8x256xf32> to vector<8x253xf32>
    %21 = tpu.concatenate %19, %20 in 1 : vector<8x3xf32>, vector<8x253xf32> -> vector<8x256xf32>
    %22 = vector.extract_strided_slice %1 {offsets = [0, 29], sizes = [8, 227], strides = [1, 1]} : vector<8x256xf32> to vector<8x227xf32>
    %23 = vector.extract_strided_slice %1 {offsets = [0, 0], sizes = [8, 29], strides = [1, 1]} : vector<8x256xf32> to vector<8x29xf32>
    %24 = tpu.concatenate %22, %23 in 1 : vector<8x227xf32>, vector<8x29xf32> -> vector<8x256xf32>
    %c3_i32 = arith.constant 3 : i32
    %25 = vector.broadcast %c3_i32 : i32 to vector<8x256xi32>
    %26 = arith.cmpi slt, %18, %25 : vector<8x256xi32>
    %27 = arith.select %26, %24, %21 : vector<8x256xi1>, vector<8x256xf32>
    %28 = vector.extract_strided_slice %1 {offsets = [0, 254], sizes = [8, 2], strides = [1, 1]} : vector<8x256xf32> to vector<8x2xf32>
    %29 = vector.extract_strided_slice %1 {offsets = [0, 0], sizes = [8, 254], strides = [1, 1]} : vector<8x256xf32> to vector<8x254xf32>
    %30 = tpu.concatenate %28, %29 in 1 : vector<8x2xf32>, vector<8x254xf32> -> vector<8x256xf32>
    %31 = vector.extract_strided_slice %1 {offsets = [0, 30], sizes = [8, 226], strides = [1, 1]} : vector<8x256xf32> to vector<8x226xf32>
    %32 = vector.extract_strided_slice %1 {offsets = [0, 0], sizes = [8, 30], strides = [1, 1]} : vector<8x256xf32> to vector<8x30xf32>
    %33 = tpu.concatenate %31, %32 in 1 : vector<8x226xf32>, vector<8x30xf32> -> vector<8x256xf32>
    %c2_i32 = arith.constant 2 : i32
    %34 = vector.broadcast %c2_i32 : i32 to vector<8x256xi32>
    %35 = arith.cmpi slt, %18, %34 : vector<8x256xi32>
    %36 = arith.select %35, %33, %30 : vector<8x256xi1>, vector<8x256xf32>
    %37 = vector.extract_strided_slice %1 {offsets = [0, 255], sizes = [8, 1], strides = [1, 1]} : vector<8x256xf32> to vector<8x1xf32>
    %38 = vector.extract_strided_slice %1 {offsets = [0, 0], sizes = [8, 255], strides = [1, 1]} : vector<8x256xf32> to vector<8x255xf32>
    %39 = tpu.concatenate %37, %38 in 1 : vector<8x1xf32>, vector<8x255xf32> -> vector<8x256xf32>
    %40 = vector.extract_strided_slice %1 {offsets = [0, 31], sizes = [8, 225], strides = [1, 1]} : vector<8x256xf32> to vector<8x225xf32>
    %41 = vector.extract_strided_slice %1 {offsets = [0, 0], sizes = [8, 31], strides = [1, 1]} : vector<8x256xf32> to vector<8x31xf32>
    %42 = tpu.concatenate %40, %41 in 1 : vector<8x225xf32>, vector<8x31xf32> -> vector<8x256xf32>
    %c1_i32_5 = arith.constant 1 : i32
    %43 = vector.broadcast %c1_i32_5 : i32 to vector<8x256xi32>
    %44 = arith.cmpi slt, %18, %43 : vector<8x256xi32>
    %45 = arith.select %44, %42, %39 : vector<8x256xi1>, vector<8x256xf32>
    %46 = vector.extract_strided_slice %1 {offsets = [0, 1], sizes = [8, 255], strides = [1, 1]} : vector<8x256xf32> to vector<8x255xf32>
    %47 = vector.extract_strided_slice %1 {offsets = [0, 0], sizes = [8, 1], strides = [1, 1]} : vector<8x256xf32> to vector<8x1xf32>
    %48 = tpu.concatenate %46, %47 in 1 : vector<8x255xf32>, vector<8x1xf32> -> vector<8x256xf32>
    %49 = vector.extract_strided_slice %1 {offsets = [0, 225], sizes = [8, 31], strides = [1, 1]} : vector<8x256xf32> to vector<8x31xf32>
    %50 = vector.extract_strided_slice %1 {offsets = [0, 0], sizes = [8, 225], strides = [1, 1]} : vector<8x256xf32> to vector<8x225xf32>
    %51 = tpu.concatenate %49, %50 in 1 : vector<8x31xf32>, vector<8x225xf32> -> vector<8x256xf32>
    %c31_i32 = arith.constant 31 : i32
    %52 = vector.broadcast %c31_i32 : i32 to vector<8x256xi32>
    %53 = arith.cmpi sge, %18, %52 : vector<8x256xi32>
    %54 = arith.select %53, %51, %48 : vector<8x256xi1>, vector<8x256xf32>
    %55 = vector.extract_strided_slice %1 {offsets = [0, 2], sizes = [8, 254], strides = [1, 1]} : vector<8x256xf32> to vector<8x254xf32>
    %56 = vector.extract_strided_slice %1 {offsets = [0, 0], sizes = [8, 2], strides = [1, 1]} : vector<8x256xf32> to vector<8x2xf32>
    %57 = tpu.concatenate %55, %56 in 1 : vector<8x254xf32>, vector<8x2xf32> -> vector<8x256xf32>
    %58 = vector.extract_strided_slice %1 {offsets = [0, 226], sizes = [8, 30], strides = [1, 1]} : vector<8x256xf32> to vector<8x30xf32>
    %59 = vector.extract_strided_slice %1 {offsets = [0, 0], sizes = [8, 226], strides = [1, 1]} : vector<8x256xf32> to vector<8x226xf32>
    %60 = tpu.concatenate %58, %59 in 1 : vector<8x30xf32>, vector<8x226xf32> -> vector<8x256xf32>
    %c30_i32 = arith.constant 30 : i32
    %61 = vector.broadcast %c30_i32 : i32 to vector<8x256xi32>
    %62 = arith.cmpi sge, %18, %61 : vector<8x256xi32>
    %63 = arith.select %62, %60, %57 : vector<8x256xi1>, vector<8x256xf32>
    %64 = vector.extract_strided_slice %1 {offsets = [0, 3], sizes = [8, 253], strides = [1, 1]} : vector<8x256xf32> to vector<8x253xf32>
    %65 = vector.extract_strided_slice %1 {offsets = [0, 0], sizes = [8, 3], strides = [1, 1]} : vector<8x256xf32> to vector<8x3xf32>
    %66 = tpu.concatenate %64, %65 in 1 : vector<8x253xf32>, vector<8x3xf32> -> vector<8x256xf32>
    %67 = vector.extract_strided_slice %1 {offsets = [0, 227], sizes = [8, 29], strides = [1, 1]} : vector<8x256xf32> to vector<8x29xf32>
    %68 = vector.extract_strided_slice %1 {offsets = [0, 0], sizes = [8, 227], strides = [1, 1]} : vector<8x256xf32> to vector<8x227xf32>
    %69 = tpu.concatenate %67, %68 in 1 : vector<8x29xf32>, vector<8x227xf32> -> vector<8x256xf32>
    %c29_i32 = arith.constant 29 : i32
    %70 = vector.broadcast %c29_i32 : i32 to vector<8x256xi32>
    %71 = arith.cmpi sge, %18, %70 : vector<8x256xi32>
    %72 = arith.select %71, %69, %66 : vector<8x256xi1>, vector<8x256xf32>
    %73 = arith.maximumf %1, %54 : vector<8x256xf32>
    %74 = arith.addf %1, %54 : vector<8x256xf32>
    %cst = arith.constant 5.000000e-01 : f32
    %75 = vector.broadcast %cst : f32 to vector<8x256xf32>
    %76 = arith.mulf %75, %74 : vector<8x256xf32>
    %77 = tpu.concatenate %73, %76 in 1 : vector<8x256xf32>, vector<8x256xf32> -> vector<8x512xf32>
    %78 = arith.truncf %77 : vector<8x512xf32> to vector<8x512xbf16>
    %c0_6 = arith.constant 0 : index
    %c0_7 = arith.constant 0 : index
    %79 = vector.load %arg3[%c0_6, %c0_7] : memref<512x256xbf16, #tpu.memory_space<vmem>>, vector<512x256xbf16>
    %cst_8 = arith.constant dense<0.000000e+00> : vector<8x256xf32>
    %80 = tpu.matmul %78, %79, %cst_8 {dimension_numbers = #tpu.dot_dimension_numbers<[1], [0], [0], [1], [0, 0, 1, 1], [], []>} : vector<8x512xbf16>, vector<512x256xbf16>, vector<8x256xf32> -> vector<8x256xf32>
    %81 = tpu.concatenate %27, %36, %45, %1, %54, %63, %72, %80 in 0 : vector<8x256xf32>, vector<8x256xf32>, vector<8x256xf32>, vector<8x256xf32>, vector<8x256xf32>, vector<8x256xf32>, vector<8x256xf32>, vector<8x256xf32> -> vector<64x256xf32>
    %c0_9 = arith.constant 0 : index
    %c0_10 = arith.constant 0 : index
    %82 = vector.load %arg2[%c0_9, %c0_10] : memref<8x64xf32, #tpu.memory_space<vmem>>, vector<8x64xf32>
    %cst_11 = arith.constant dense<0.000000e+00> : vector<8x256xf32>
    %83 = tpu.matmul %82, %81, %cst_11 {dimension_numbers = #tpu.dot_dimension_numbers<[1], [0], [0], [1], [0, 0, 1, 1], [], []>} : vector<8x64xf32>, vector<64x256xf32>, vector<8x256xf32> -> vector<8x256xf32>
    %c0_12 = arith.constant 0 : index
    %c0_13 = arith.constant 0 : index
    %84 = vector.load %arg4[%c0_12, %c0_13] : memref<8x256xf32, #tpu.memory_space<vmem>>, vector<8x256xf32>
    %85 = arith.addf %83, %84 : vector<8x256xf32>
    %c0_14 = arith.constant 0 : index
    %c0_15 = arith.constant 0 : index
    %c0_16 = arith.constant 0 : index
    %86 = vector.load %arg5[%c0_14, %c0_15, %c0_16] : memref<1x8x256xf32, #tpu.memory_space<vmem>>, vector<1x8x256xf32>
    %87 = vector.shape_cast %86 : vector<1x8x256xf32> to vector<8x256xf32>
    %88 = vector.shape_cast %85 : vector<8x256xf32> to vector<1x8x256xf32>
    tpu.vector_store %arg5[%c0_14, %c0_15, %c0_16], %88 {strides = array<i32>} : memref<1x8x256xf32, #tpu.memory_space<vmem>>, vector<1x8x256xf32>,
    return
  }
  func.func @transform_0(%arg0: i32) -> (i32, i32, i32) {
    %c0_i32 = arith.constant 0 : i32
    %c0_i32_0 = arith.constant 0 : i32
    %c0_i32_1 = arith.constant 0 : i32
    return %arg0, %c0_i32, %c0_i32_0 : i32, i32, i32
  }
  func.func @transform_1(%arg0: i32) -> (i32, i32) {
    %c0_i32 = arith.constant 0 : i32
    %c0_i32_0 = arith.constant 0 : i32
    %c0_i32_1 = arith.constant 0 : i32
    return %c0_i32, %c0_i32_0 : i32, i32
  }
  func.func @transform_2(%arg0: i32) -> (i32, i32) {
    %c0_i32 = arith.constant 0 : i32
    %c0_i32_0 = arith.constant 0 : i32
    %c0_i32_1 = arith.constant 0 : i32
    return %c0_i32, %c0_i32_0 : i32, i32
  }
  func.func @transform_3(%arg0: i32) -> (i32, i32) {
    %c0_i32 = arith.constant 0 : i32
    %c0_i32_0 = arith.constant 0 : i32
    %c0_i32_1 = arith.constant 0 : i32
    return %c0_i32, %c0_i32_0 : i32, i32
  }
  func.func @transform_4(%arg0: i32) -> (i32, i32, i32) {
    %c0_i32 = arith.constant 0 : i32
    %c0_i32_0 = arith.constant 0 : i32
    %c0_i32_1 = arith.constant 0 : i32
    return %arg0, %c0_i32, %c0_i32_0 : i32, i32, i32
  }
}

</mosaic_0001>

<bundles_post_ra>
// kernel: tile.8
= control target key start
LH: loop header
LB: loop body
LE: loop exit
PB: predicated region body
PF: predicated region fallthrough
CT: control target
= control target key end

     0   :  { %s22_s0 = inlined_call_operand.vmem [shape: f32[32], index: 0, kind: input, shape index: {}]   ;;  %s23_s1 = inlined_call_operand.vmem [shape: f32[8,32], index: 1, kind: output, shape index: {}]  }
   0x1   :  { %v4_v0 = vld [vmem:[%s22_s0] ss:$0 sm:$0xff] }
   0x2   :  { %5 = vst [vmem:[%s23_s1] sm:$0xff] %v4_v0 }

// kernel: mul.29
= control target key start
LH: loop header
LB: loop body
LE: loop exit
PB: predicated region body
PF: predicated region fallthrough
CT: control target
= control target key end

     0   :  { %s7_s6 = smov 3  ;;  %s14_s9 = smov 3  ;;  %vm4_vm0 = vcmask 261120   ;;  %vm11_vm1 = vcmask 1048320   ;;  %vm18_vm2 = vcmask 785920   ;;  %vm25_vm3 = vcmask 523520   ;;  %s67_s0 = inlined_call_operand.vmem [shape: f32[8,32], index: 0, kind: input, shape index: {}]   ;;  %s68_s1 = inlined_call_operand.vmem [shape: f32[256], index: 1, kind: output, shape index: {}]  }
   0x1   :  { %v33_v0 = vld [vmem:[%s67_s0 + $0x3] ss:$4 sm:%s7_s6]   ;;  %s39_s10 = smov 96   ;;  %s21_s11 = smov 3  ;;  %v34_v1 = vld [vmem:[%s67_s0 + $0x2] ss:$4 sm:%s14_s9]  }
   0x2   :  { %9 = vrot.lane.b32.xlu0 %v33_v0, %s39_s10  ;;  %v35_v2 = vld [vmem:[%s67_s0 + $0x1] ss:$4 sm:%s21_s11]   ;;  %s2_s16 = smov 3  ;;  %s40_s17 = smov 32  }
   0x3   :  { %23 = vrot.lane.b32.xlu1 %v35_v2, %s40_s17  ;;  %v3_v3 = vld [vmem:[%s67_s0] ss:$4 sm:%s2_s16]   ;;  %s41_s0 = smov 64  }
   0x4   :  { %5 = vst.msk [vmem:[#allocation0] sm:$0x3] %vm4_vm0, %v3_v3  }
   0x6   :  { %16 = vrot.lane.b32.xlu0 %v34_v1, %s41_s0 }
  0x74   :  { %v10_v4 = vpop.permute.xlu0 %9  }
  0x75   :  { %12 = vst.msk [vmem:[#allocation0] sm:$0x3] %vm11_vm1, %v10_v4   ;;  %v24_v5 = vpop.permute.xlu1 %23  }
  0x78   :  { %v17_v6 = vpop.permute.xlu0 %16  }
  0x79   :  { %19 = vst.msk [vmem:[#allocation0] sm:$0x3] %vm18_vm2, %v17_v6  }
  0x7a   :  { %26 = vst.msk [vmem:[#allocation0] sm:$0x3] %vm25_vm3, %v24_v5  }
  0x81   :  { %v30_v7 = vld [vmem:[#allocation0] sm:$0x3] }
  0x82   :  { %32 = vst [vmem:[%s68_s1] sm:$0x3] %v30_v7 }

// kernel: spatial_convs_pallas.1
= control target key start
LH: loop header
LB: loop body
LE: loop exit
PB: predicated region body
PF: predicated region fallthrough
CT: control target
= control target key end

     0   :  { %s994_s19 = smov 31   ;;  %s995_s20 = smov 127   ;;  %vm135_vm0 = vcmask 252928   ;;  %vm124_vm1 = vcmask 1039360   ;;  %vm62_vm4 = vcmask 809984   ;;  %vm53_vm5 = vcmask 23552   ;;  %s1324_s0 = inlined_call_operand.vmem [shape: f32[1,8,256], index: 0, kind: input, shape index: {}]   ;;  %s1325_s2 = inlined_call_operand.vmem [shape: bf16[512,256], index: 2, kind: input, shape index: {}]   ;;  %s1326_s1 = inlined_call_operand.vmem [shape: f32[8,64], index: 1, kind: input, shape index: {}]   ;;  %s1327_s3 = inlined_call_operand.vmem [shape: f32[8,256], index: 3, kind: input, shape index: {}]   ;;  %s1328_s4 = inlined_call_operand.vmem [shape: f32[1,8,256], index: 4, kind: output, shape index: {}]  }
   0x1   :  { %v1035_v0 = vld [vmem:[%s1324_s0 + $0x8] sm:$0xff]  ;;  %v1040_v1 = vld [vmem:[%s1324_s0] sm:$0xff]  ;;  %v904_v6 = vld [vmem:[%s1325_s2 + $0x14] ss:$8 sps:$4 sm:$0xff]   ;;  %s996_s14 = smov 99   ;;  %s997_s15 = smov 3  }
   0x2   :  { %130 = vrot.lane.b32.xlu1 %v1035_v0, %s994_s19  ;;  %120 = vrot.lane.b32.xlu0 %v1040_v1, %s995_s20  ;;  %v898_v2 = vld [vmem:[%s1325_s2 + $0x4] ss:$8 sps:$4 sm:$0xff]   ;;  %v900_v3 = vld [vmem:[%s1325_s2] ss:$8 sps:$4 sm:$0xff]   ;;  %v1063_v7 = vpack.i.bf16 %v1035_v0, %v1040_v1  ;;  %v848_v8 = vpack.i.bf16 %v1040_v1, %v1035_v0  ;;  %s998_s26 = smov 98   ;;  %s999_s0 = smov 2  }
   0x3   :  { %586 = vmatprep.subr.bf16.mxu1 %v898_v2  ;;  %v901_v4 = vld [vmem:[%s1325_s2 + $0x104] ss:$8 sps:$4 sm:$0xff]   ;;  %v903_v5 = vld [vmem:[%s1325_s2 + $0x100] ss:$8 sps:$4 sm:$0xff]   ;;  %v906_v9 = vld [vmem:[%s1325_s2 + $0x10] ss:$8 sps:$4 sm:$0xff]  }
   0x4   :  { %587 = vmatpush1.bf16.msra.mxu1 %v900_v3  ;;  %627 = vmatprep.subr.bf16.mxu0 %v901_v4  ;;  %v907_v10 = vld [vmem:[%s1325_s2 + $0x114] ss:$8 sps:$4 sm:$0xff]   ;;  %v909_v11 = vld [vmem:[%s1325_s2 + $0x110] ss:$8 sps:$4 sm:$0xff]   ;;  %v910_v12 = vld [vmem:[%s1325_s2 + $0x24] ss:$8 sps:$4 sm:$0xff]  }
   0x5   :  { %588 = vmatprep.subr.bf16.mxu1 %v904_v6  ;;  %628 = vmatpush1.bf16.msra.mxu0 %v903_v5  ;;  %v912_v13 = vld [vmem:[%s1325_s2 + $0x20] ss:$8 sps:$4 sm:$0xff]   ;;  %v913_v14 = vld [vmem:[%s1325_s2 + $0x124] ss:$8 sps:$4 sm:$0xff]   ;;  %v916_v15 = vld [vmem:[%s1325_s2 + $0x34] ss:$8 sps:$4 sm:$0xff]   ;;  %v19_v6 = vlaneseq }
   0x6   :  { %133 = vrot.lane.b32.xlu1 %v1040_v1, %s994_s19  ;;  %122 = vrot.lane.b32.xlu0 %v1035_v0, %s995_s20  ;;  %v915_v16 = vld [vmem:[%s1325_s2 + $0x120] ss:$8 sps:$4 sm:$0xff]   ;;  %v918_v17 = vld [vmem:[%s1325_s2 + $0x30] ss:$8 sps:$4 sm:$0xff]   ;;  %s1000_s9 = smov 97   ;;  %s1001_s10 = smov 1  }
   0x7   :  { %629 = vmatprep.subr.bf16.mxu0 %v907_v10  ;;  %v919_v18 = vld [vmem:[%s1325_s2 + $0x134] ss:$8 sps:$4 sm:$0xff]   ;;  %v922_v19 = vld [vmem:[%s1325_s2 + $0x44] ss:$8 sps:$4 sm:$0xff]   ;;  %v921_v20 = vld [vmem:[%s1325_s2 + $0x130] ss:$8 sps:$4 sm:$0xff]  }
   0x8   :  { %589 = vmatpush1.bf16.msra.mxu1 %v906_v9  ;;  %v924_v21 = vld [vmem:[%s1325_s2 + $0x40] ss:$8 sps:$4 sm:$0xff]   ;;  %v925_v22 = vld [vmem:[%s1325_s2 + $0x144] ss:$8 sps:$4 sm:$0xff]   ;;  %v928_v23 = vld [vmem:[%s1325_s2 + $0x54] ss:$8 sps:$4 sm:$0xff]  }
   0x9   :  { %590 = vmatprep.subr.bf16.mxu1 %v910_v12  ;;  %630 = vmatpush1.bf16.msra.mxu0 %v909_v11  ;;  %v927_v24 = vld [vmem:[%s1325_s2 + $0x140] ss:$8 sps:$4 sm:$0xff]   ;;  %v930_v25 = vld [vmem:[%s1325_s2 + $0x50] ss:$8 sps:$4 sm:$0xff]   ;;  %v931_v26 = vld [vmem:[%s1325_s2 + $0x154] ss:$8 sps:$4 sm:$0xff]  }
   0xa   :  { %854 = vrot.lane.b32.xlu1 %v1063_v7, %s996_s14  ;;  %849 = vrot.lane.b32.xlu0 %v848_v8, %s997_s15  ;;  %s1002_s19 = smov 30   ;;  %s1003_s20 = smov 126   ;;  %v934_v27 = vld [vmem:[%s1325_s2 + $0x64] ss:$8 sps:$4 sm:$0xff]   ;;  %v933_v28 = vld [vmem:[%s1325_s2 + $0x150] ss:$8 sps:$4 sm:$0xff]  }
   0xb   :  { %631 = vmatprep.subr.bf16.mxu0 %v913_v14  ;;  %v936_v29 = vld [vmem:[%s1325_s2 + $0x60] ss:$8 sps:$4 sm:$0xff]   ;;  %v937_v30 = vld [vmem:[%s1325_s2 + $0x164] ss:$8 sps:$4 sm:$0xff]   ;;  %v940_v31 = vld [vmem:[%s1325_s2 + $0x74] ss:$8 sps:$4 sm:$0xff]  }
   0xc   :  { %591 = vmatpush1.bf16.msra.mxu1 %v912_v13  ;;  %s1004_s30 = smov 29   ;;  %v939_v32 = vld [vmem:[%s1325_s2 + $0x160] ss:$8 sps:$4 sm:$0xff]   ;;  %s1005_s7 = smov 125   ;;  %v942_v33 = vld [vmem:[%s1325_s2 + $0x70] ss:$8 sps:$4 sm:$0xff]  }
   0xd   :  { %592 = vmatprep.subr.bf16.mxu1 %v916_v15  ;;  %632 = vmatpush1.bf16.msra.mxu0 %v915_v16  ;;  %v943_v34 = vld [vmem:[%s1325_s2 + $0x174] ss:$8 sps:$4 sm:$0xff]   ;;  %v946_v35 = vld [vmem:[%s1325_s2 + $0x84] ss:$8 sps:$4 sm:$0xff]   ;;  %v945_v36 = vld [vmem:[%s1325_s2 + $0x170] ss:$8 sps:$4 sm:$0xff]  }
   0xe   :  { %864 = vrot.lane.b32.xlu1 %v1063_v7, %s998_s26  ;;  %859 = vrot.lane.b32.xlu0 %v848_v8, %s999_s0  ;;  %v948_v37 = vld [vmem:[%s1325_s2 + $0x80] ss:$8 sps:$4 sm:$0xff]   ;;  %v949_v38 = vld [vmem:[%s1325_s2 + $0x184] ss:$8 sps:$4 sm:$0xff]   ;;  %vm86_vm6 = vcmask 801792   ;;  %vm77_vm7 = vcmask 15360  }
   0xf   :  { %633 = vmatprep.subr.bf16.mxu0 %v919_v18  ;;  %v952_v39 = vld [vmem:[%s1325_s2 + $0x94] ss:$8 sps:$4 sm:$0xff]   ;;  %v951_v40 = vld [vmem:[%s1325_s2 + $0x180] ss:$8 sps:$4 sm:$0xff]   ;;  %v954_v41 = vld [vmem:[%s1325_s2 + $0x90] ss:$8 sps:$4 sm:$0xff]  }
  0x10   :  { %593 = vmatpush1.bf16.msra.mxu1 %v918_v17  ;;  %v955_v42 = vld [vmem:[%s1325_s2 + $0x194] ss:$8 sps:$4 sm:$0xff]   ;;  %v958_v43 = vld [vmem:[%s1325_s2 + $0xa4] ss:$8 sps:$4 sm:$0xff]   ;;  %v957_v44 = vld [vmem:[%s1325_s2 + $0x190] ss:$8 sps:$4 sm:$0xff]  }
  0x11   :  { %594 = vmatprep.subr.bf16.mxu1 %v922_v19  ;;  %634 = vmatpush1.bf16.msra.mxu0 %v921_v20  ;;  %v960_v45 = vld [vmem:[%s1325_s2 + $0xa0] ss:$8 sps:$4 sm:$0xff]   ;;  %v961_v46 = vld [vmem:[%s1325_s2 + $0x1a4] ss:$8 sps:$4 sm:$0xff]   ;;  %v964_v47 = vld [vmem:[%s1325_s2 + $0xb4] ss:$8 sps:$4 sm:$0xff]  }
  0x12   :  { %874 = vrot.lane.b32.xlu1 %v1063_v7, %s1000_s9  ;;  %869 = vrot.lane.b32.xlu0 %v848_v8, %s1001_s10  ;;  %v963_v48 = vld [vmem:[%s1325_s2 + $0x1a0] ss:$8 sps:$4 sm:$0xff]   ;;  %v966_v49 = vld [vmem:[%s1325_s2 + $0xb0] ss:$8 sps:$4 sm:$0xff]   ;;  %vm110_vm12 = vcmask 793600   ;;  %vm101_vm13 = vcmask 7168  }
  0x13   :  { %635 = vmatprep.subr.bf16.mxu0 %v925_v22  ;;  %v967_v50 = vld [vmem:[%s1325_s2 + $0x1b4] ss:$8 sps:$4 sm:$0xff]   ;;  %v970_v51 = vld [vmem:[%s1325_s2 + $0xc4] ss:$8 sps:$4 sm:$0xff]   ;;  %v969_v52 = vld [vmem:[%s1325_s2 + $0x1b0] ss:$8 sps:$4 sm:$0xff]  }
  0x14   :  { %595 = vmatpush1.bf16.msra.mxu1 %v924_v21  ;;  %v972_v53 = vld [vmem:[%s1325_s2 + $0xc0] ss:$8 sps:$4 sm:$0xff]   ;;  %v973_v54 = vld [vmem:[%s1325_s2 + $0x1c4] ss:$8 sps:$4 sm:$0xff]   ;;  %v976_v55 = vld [vmem:[%s1325_s2 + $0xd4] ss:$8 sps:$4 sm:$0xff]  }
  0x15   :  { %596 = vmatprep.subr.bf16.mxu1 %v928_v23  ;;  %636 = vmatpush1.bf16.msra.mxu0 %v927_v24  ;;  %v975_v56 = vld [vmem:[%s1325_s2 + $0x1c0] ss:$8 sps:$4 sm:$0xff]   ;;  %v978_v57 = vld [vmem:[%s1325_s2 + $0xd0] ss:$8 sps:$4 sm:$0xff]   ;;  %v979_v58 = vld [vmem:[%s1325_s2 + $0x1d4] ss:$8 sps:$4 sm:$0xff]  }
  0x16   :  { %884 = vrot.lane.b32.xlu1 %v848_v8, %s1002_s19  ;;  %879 = vrot.lane.b32.xlu0 %v1063_v7, %s1003_s20  ;;  %v982_v59 = vld [vmem:[%s1325_s2 + $0xe4] ss:$8 sps:$4 sm:$0xff]   ;;  %v981_v60 = vld [vmem:[%s1325_s2 + $0x1d0] ss:$8 sps:$4 sm:$0xff]  }
  0x17   :  { %637 = vmatprep.subr.bf16.mxu0 %v931_v26  ;;  %v984_v61 = vld [vmem:[%s1325_s2 + $0xe0] ss:$8 sps:$4 sm:$0xff]   ;;  %v985_v62 = vld [vmem:[%s1325_s2 + $0x1e4] ss:$8 sps:$4 sm:$0xff]   ;;  %v988_v63 = vld [vmem:[%s1325_s2 + $0xf4] ss:$8 sps:$4 sm:$0xff]  }
  0x18   :  { %597 = vmatpush1.bf16.msra.mxu1 %v930_v25  ;;  %v987_v2 = vld [vmem:[%s1325_s2 + $0x1e0] ss:$8 sps:$4 sm:$0xff]   ;;  %v990_v3 = vld [vmem:[%s1325_s2 + $0xf0] ss:$8 sps:$4 sm:$0xff]   ;;  %v991_v4 = vld [vmem:[%s1325_s2 + $0x1f4] ss:$8 sps:$4 sm:$0xff]  }
  0x19   :  { %598 = vmatprep.subr.bf16.mxu1 %v934_v27  ;;  %638 = vmatpush1.bf16.msra.mxu0 %v933_v28  ;;  %v993_v5 = vld [vmem:[%s1325_s2 + $0x1f0] ss:$8 sps:$4 sm:$0xff]  }
  0x1a   :  { %894 = vrot.lane.b32.xlu1 %v848_v8, %s1004_s30  ;;  %889 = vrot.lane.b32.xlu0 %v1063_v7, %s1005_s7  ;;  %v20_v7 = vand.u32 127, %v19_v6 }
  0x1b   :  { %639 = vmatprep.subr.bf16.mxu0 %v937_v30 }
  0x1c   :  { %599 = vmatpush1.bf16.msra.mxu1 %v936_v29  ;;  %v21_v8 = vadd.s32 128, %v20_v7  ;;  %v1249_v9 = vand.u32 31, %v20_v7 }
  0x1d   :  { %600 = vmatprep.subr.bf16.mxu1 %v940_v31  ;;  %640 = vmatpush1.bf16.msra.mxu0 %v939_v32 }
  0x1e   :  { %641 = vmatprep.subr.bf16.mxu0 %v943_v34  ;;  %v1251_v10 = vand.u32 31, %v21_v8  ;;  %vm140_vm2 = vcmp.ge.s32.totalorder %v1249_v9, 31  ;;  %vm68_vm9 = vcmp.lt.s32.totalorder %v1249_v9, 3  ;;  %vm92_vm11 = vcmp.lt.s32.totalorder %v1249_v9, 2 }
  0x1f   :  { %vm116_vm15 = vcmp.lt.s32.totalorder %v1249_v9, 1 }
  0x20   :  { %601 = vmatpush1.bf16.msra.mxu1 %v942_v33  ;;  %vm141_vm3 = vcmp.ge.s32.totalorder %v1251_v10, 31  ;;  %vm69_vm8 = vcmp.lt.s32.totalorder %v1251_v10, 3  ;;  %vm93_vm10 = vcmp.lt.s32.totalorder %v1251_v10, 2  ;;  %vm117_vm14 = vcmp.lt.s32.totalorder %v1251_v10, 1 }
  0x21   :  { %602 = vmatprep.subr.bf16.mxu1 %v946_v35  ;;  %642 = vmatpush1.bf16.msra.mxu0 %v945_v36 }
  0x22   :  { %643 = vmatprep.subr.bf16.mxu0 %v949_v38 }
  0x24   :  { %603 = vmatpush1.bf16.msra.mxu1 %v948_v37 }
  0x25   :  { %604 = vmatprep.subr.bf16.mxu1 %v952_v39  ;;  %644 = vmatpush1.bf16.msra.mxu0 %v951_v40 }
  0x26   :  { %645 = vmatprep.subr.bf16.mxu0 %v955_v42 }
  0x28   :  { %605 = vmatpush1.bf16.msra.mxu1 %v954_v41 }
  0x29   :  { %606 = vmatprep.subr.bf16.mxu1 %v958_v43  ;;  %646 = vmatpush1.bf16.msra.mxu0 %v957_v44 }
  0x2a   :  { %647 = vmatprep.subr.bf16.mxu0 %v961_v46 }
  0x2c   :  { %607 = vmatpush1.bf16.msra.mxu1 %v960_v45 }
  0x2d   :  { %608 = vmatprep.subr.bf16.mxu1 %v964_v47  ;;  %648 = vmatpush1.bf16.msra.mxu0 %v963_v48 }
  0x2e   :  { %649 = vmatprep.subr.bf16.mxu0 %v967_v50 }
  0x30   :  { %609 = vmatpush1.bf16.msra.mxu1 %v966_v49 }
  0x31   :  { %610 = vmatprep.subr.bf16.mxu1 %v970_v51  ;;  %650 = vmatpush1.bf16.msra.mxu0 %v969_v52 }
  0x32   :  { %651 = vmatprep.subr.bf16.mxu0 %v973_v54 }
  0x34   :  { %611 = vmatpush1.bf16.msra.mxu1 %v972_v53 }
  0x35   :  { %612 = vmatprep.subr.bf16.mxu1 %v976_v55  ;;  %652 = vmatpush1.bf16.msra.mxu0 %v975_v56 }
  0x36   :  { %653 = vmatprep.subr.bf16.mxu0 %v979_v58 }
  0x38   :  { %613 = vmatpush1.bf16.msra.mxu1 %v978_v57 }
  0x39   :  { %614 = vmatprep.subr.bf16.mxu1 %v982_v59  ;;  %654 = vmatpush1.bf16.msra.mxu0 %v981_v60 }
  0x3a   :  { %655 = vmatprep.subr.bf16.mxu0 %v985_v62 }
  0x3c   :  { %615 = vmatpush1.bf16.msra.mxu1 %v984_v61 }
  0x3d   :  { %616 = vmatprep.subr.bf16.mxu1 %v988_v63  ;;  %656 = vmatpush1.bf16.msra.mxu0 %v987_v2 }
  0x3e   :  { %657 = vmatprep.subr.bf16.mxu0 %v991_v4 }
  0x40   :  { %617 = vmatpush1.bf16.msra.mxu1 %v990_v3 }
  0x41   :  { %658 = vmatpush1.bf16.msra.mxu0 %v993_v5 }
  0x74   :  { %v131_v11 = vpop.permute.xlu1 %130  ;;  %v121_v12 = vpop.permute.xlu0 %120 }
  0x78   :  { %v134_v13 = vpop.permute.xlu1 %133  ;;  %v123_v14 = vpop.permute.xlu0 %122 }
  0x79   :  { %v136_v15 = vsel %vm135_vm0, %v134_v13, %v131_v11  ;;  %v139_v16 = vsel %vm135_vm0, %v131_v11, %v134_v13  ;;  %v125_v17 = vsel %vm124_vm1, %v121_v12, %v123_v14  ;;  %v129_v18 = vsel %vm124_vm1, %v123_v14, %v121_v12 }
  0x7a   :  { %v1255_v19 = vsel %vm140_vm2, %v139_v16, %v125_v17  ;;  %v1257_v20 = vsel %vm141_vm3, %v136_v15, %v129_v18  ;;  %vm159_vm0 = vcmask 244736   ;;  %vm148_vm1 = vcmask 1031168  }
  0x7b   :  { %v193_v21 = vmax.f32 %v1035_v0, %v1257_v20  ;;  %v192_v22 = vmax.f32 %v1040_v1, %v1255_v19  ;;  %v195_v23 = vadd.f32 %v1257_v20, %v1035_v0  ;;  %v194_v24 = vadd.f32 %v1255_v19, %v1040_v1 }
  0x7c   :  { %v855_v25 = vpop.permute.xlu1 %854  ;;  %v850_v26 = vpop.permute.xlu0 %849  ;;  %vm165_vm2 = vcmp.ge.s32.totalorder %v1251_v10, 30  ;;  %vm164_vm3 = vcmp.ge.s32.totalorder %v1249_v9, 30 }
  0x7d   :  { %v857_v27 = vunpack.i.h.bf16 %v855_v25  ;;  %v856_v28 = vunpack.i.l.bf16 %v855_v25  ;;  %v852_v29 = vunpack.i.h.bf16 %v850_v26  ;;  %v851_v30 = vunpack.i.l.bf16 %v850_v26 }
  0x7e   :  { %v199_v31 = vpack.c.bf16 %v193_v21, %v193_v21  ;;  %v198_v32 = vpack.c.bf16 %v192_v22, %v192_v22  ;;  %v197_v33 = vmul.f32 0.5, %v195_v23  ;;  %v196_v34 = vmul.f32 0.5, %v194_v24 }
  0x7f   :  { %v63_v35 = vsel %vm62_vm4, %v856_v28, %v857_v27  ;;  %v67_v36 = vsel %vm62_vm4, %v857_v27, %v856_v28  ;;  %v54_v37 = vsel %vm53_vm5, %v852_v29, %v851_v30  ;;  %v57_v38 = vsel %vm53_vm5, %v851_v30, %v852_v29 }
  0x80   :  { %618 = vmatprep.mubr.bf16.mxu1 %v199_v31  ;;  %v865_v39 = vpop.permute.xlu1 %864  ;;  %v860_v40 = vpop.permute.xlu0 %859  ;;  %v201_v41 = vpack.c.bf16 %v197_v33, %v197_v33  ;;  %v200_v42 = vpack.c.bf16 %v196_v34, %v196_v34  ;;  %v71_v47 = vsel %vm69_vm8, %v67_v36, %v54_v37  ;;  %v70_v48 = vsel %vm68_vm9, %v63_v35, %v57_v38 }
  0x81   :  { %v867_v43 = vunpack.i.h.bf16 %v865_v39  ;;  %v866_v44 = vunpack.i.l.bf16 %v865_v39  ;;  %619 = vmatmul.mubr.bf16.vlgmr.msra.gmra.mrb[0].mxu1 %v198_v32  ;;  %v862_v45 = vunpack.i.h.bf16 %v860_v40  ;;  %v861_v46 = vunpack.i.l.bf16 %v860_v40 }
  0x82   :  { %659 = vmatprep.mubr.bf16.mxu0 %v201_v41  ;;  %vm183_vm4 = vcmask 236544   ;;  %vm172_vm5 = vcmask 1022976   ;;  %vm671_vm8 = vcmask 523264  }
  0x83   :  { %v87_v49 = vsel %vm86_vm6, %v866_v44, %v867_v43  ;;  %v91_v50 = vsel %vm86_vm6, %v867_v43, %v866_v44  ;;  %v78_v51 = vsel %vm77_vm7, %v862_v45, %v861_v46  ;;  %v81_v52 = vsel %vm77_vm7, %v861_v46, %v862_v45  ;;  %660 = vmatmul.mubr.bf16.vlgmr.msra.gmra.mrb[0].mxu0 %v200_v42 }
  0x84   :  { %v875_v53 = vpop.permute.xlu1 %874  ;;  %v870_v54 = vpop.permute.xlu0 %869  ;;  %v95_v55 = vsel %vm93_vm10, %v91_v50, %v78_v51  ;;  %v94_v56 = vsel %vm92_vm11, %v87_v49, %v81_v52  ;;  %vm189_vm6 = vcmp.ge.s32.totalorder %v1251_v10, 29  ;;  %vm188_vm7 = vcmp.ge.s32.totalorder %v1249_v9, 29  ;;  %v668_v10 = vld [vmem:[%s1326_s1] sm:$0xff] }
  0x85   :  { %v877_v57 = vunpack.i.h.bf16 %v875_v53  ;;  %v876_v58 = vunpack.i.l.bf16 %v875_v53  ;;  %v872_v59 = vunpack.i.h.bf16 %v870_v54  ;;  %v871_v60 = vunpack.i.l.bf16 %v870_v54  ;;  %v669_v9 = vld [vmem:[%s1327_s3] sm:$0xff] }
  0x86   :  { %v817_v61 = vpack.c.bf16 %v95_v55, %v71_v47  ;;  %v819_v62 = vpack.c.bf16 %v94_v56, %v70_v48  ;;  %v670_v48 = vld [vmem:[%s1327_s3 + $0x8] sm:$0xff] }
  0x87   :  { %v111_v63 = vsel %vm110_vm12, %v876_v58, %v877_v57  ;;  %v115_v2 = vsel %vm110_vm12, %v877_v57, %v876_v58  ;;  %v102_v3 = vsel %vm101_vm13, %v872_v59, %v871_v60  ;;  %v105_v4 = vsel %vm101_vm13, %v871_v60, %v872_v59 }
  0x88   :  { %818 = vmatprep.subr.bf16.mxu1 %v817_v61  ;;  %v885_v5 = vpop.permute.xlu1 %884  ;;  %v880_v6 = vpop.permute.xlu0 %879  ;;  %v119_v7 = vsel %vm117_vm14, %v115_v2, %v102_v3  ;;  %v118_v8 = vsel %vm116_vm15, %v111_v63, %v105_v4 }
  0x89   :  { %v887_v11 = vunpack.i.h.bf16 %v885_v5  ;;  %v886_v12 = vunpack.i.l.bf16 %v885_v5  ;;  %v882_v13 = vunpack.i.h.bf16 %v880_v6  ;;  %v881_v14 = vunpack.i.l.bf16 %v880_v6  ;;  %820 = vmatpush1.bf16.msra.mxu1 %v819_v62 }
  0x8a   :  { %v821_v15 = vpack.c.bf16 %v1035_v0, %v119_v7  ;;  %v823_v16 = vpack.c.bf16 %v1040_v1, %v118_v8  ;;  %v1006_v0 = vmov 0.0  }
  0x8b   :  { %v160_v17 = vsel %vm159_vm0, %v887_v11, %v886_v12  ;;  %v163_v18 = vsel %vm159_vm0, %v886_v12, %v887_v11  ;;  %v149_v21 = vsel %vm148_vm1, %v881_v14, %v882_v13  ;;  %v153_v22 = vsel %vm148_vm1, %v882_v13, %v881_v14  ;;  %739 = vmatprep.mubr.f32.mxu1 %v1006_v0 }
  0x8c   :  { %822 = vmatprep.subr.bf16.mxu1 %v821_v15  ;;  %v167_v23 = vsel %vm165_vm2, %v160_v17, %v153_v22  ;;  %v166_v24 = vsel %vm164_vm3, %v163_v18, %v149_v21  ;;  %v895_v1 = vpop.permute.xlu1 %894  ;;  %v890_v27 = vpop.permute.xlu0 %889 }
  0x8d   :  { %824 = vmatpush1.bf16.msra.mxu1 %v823_v16  ;;  %v825_v25 = vpack.c.bf16 %v167_v23, %v1257_v20  ;;  %v827_v26 = vpack.c.bf16 %v166_v24, %v1255_v19  ;;  %v897_v28 = vunpack.i.h.bf16 %v895_v1  ;;  %v896_v29 = vunpack.i.l.bf16 %v895_v1 }
  0x8e   :  { %v892_v30 = vunpack.i.h.bf16 %v890_v27  ;;  %v891_v31 = vunpack.i.l.bf16 %v890_v27 }
  0x8f   :  { %826 = vmatprep.subr.bf16.mxu1 %v825_v25  ;;  %v184_v32 = vsel %vm183_vm4, %v897_v28, %v896_v29  ;;  %v187_v20 = vsel %vm183_vm4, %v896_v29, %v897_v28 }
  0x90   :  { %v177_v34 = vsel %vm172_vm5, %v892_v30, %v891_v31  ;;  %v173_v35 = vsel %vm172_vm5, %v891_v31, %v892_v30 }
  0x91   :  { %828 = vmatpush1.bf16.msra.mxu1 %v827_v26  ;;  %v191_v40 = vsel %vm189_vm6, %v184_v32, %v177_v34  ;;  %v190_v42 = vsel %vm188_vm7, %v187_v20, %v173_v35 }
 0x154   :  { %v620_v33 = vpop.f32.mrb[0].mxu1 }
 0x155   :  { %v622_v19 = vpop.f32.mrb[1].mxu1 }
 0x156   :  { %v624_v36 = vpop.f32.mrb[2].mxu1  ;;  %v661_v37 = vpop.f32.mrb[0].mxu0 }
 0x157   :  { %v662_v38 = vadd.f32 %v661_v37, %v620_v33  ;;  %v625_v39 = vpop.f32.mrb[3].mxu1  ;;  %v663_v41 = vpop.f32.mrb[1].mxu0 }
 0x158   :  { %v664_v43 = vadd.f32 %v663_v41, %v622_v19  ;;  %v665_v44 = vpop.f32.mrb[2].mxu0 }
 0x159   :  { %v666_v45 = vpop.f32.mrb[3].mxu0  ;;  %v831_v47 = vpack.c.bf16 %v662_v38, %v190_v42 }
 0x15a   :  { %v829_v46 = vpack.c.bf16 %v664_v43, %v191_v40 }
 0x15c   :  { %830 = vmatprep.subr.bf16.mxu1 %v829_v46 }
 0x15d   :  { %832 = vmatpush1.bf16.msra.mxu1 %v831_v47 }
 0x160   :  { %816 = vmatmul.mubr.msk.f32.vlgmr.msra.gmra.mrb[4].mxu1 %vm671_vm8, %v668_v10 }
 0x233   :  { %v741_v49 = vpop.f32.mrb[4].mxu1 }
 0x234   :  { %v742_v50 = vadd.f32 %v741_v49, %v669_v9  ;;  %v743_v51 = vpop.f32.mrb[5].mxu1 }
 0x235   :  { %v744_v52 = vadd.f32 %v743_v51, %v670_v48 }
 0x236   :  { %746 = vst [vmem:[%s1328_s4] sm:$0xff] %v742_v50 }
 0x237   :  { %747 = vst [vmem:[%s1328_s4 + $0x8] sm:$0xff] %v744_v52 }

</bundles_post_ra>
